<compile_context>
chip_gen: v7x
topology: tpu7x:2x2x1
jax: 0.10.0
libtpu: 0.0.40
codegen_flags: <defaults>
</compile_context>

<pallas_src>
import functools

import jax
import jax.numpy as jnp
from jax.experimental import pallas as pl
from jax.experimental.pallas import tpu as pltpu


def domain_disc_kernel(x_ref, w_ref, b_ref, o_ref, acc_ref, *, inv_s):
    # x_ref: (TB, C, TS)   current tile of the flattened (B, C, S) input
    # w_ref: (C, D)        transposed Linear weight
    # b_ref: (1, D)        bias
    # o_ref: (TB, D)       output tile (resident across the S axis)
    # acc_ref: (TB, C) f32 running sum over S
    s = pl.program_id(1)

    @pl.when(s == 0)
    def _init():
        acc_ref[...] = jnp.zeros_like(acc_ref)

    # Sum-accumulate this S tile (cast-on-load so bf16 inputs work; f32 accum).
    x = x_ref[...].astype(jnp.float32)                      # (TB, C, TS)
    acc_ref[...] += jnp.sum(x, axis=2)                      # (TB, C)

    @pl.when(s == pl.num_programs(1) - 1)
    def _epilogue():
        # mean over T*H*W == sum * (1/S)  (gradient reversal is identity fwd)
        pooled = acc_ref[...] * inv_s                       # (TB, C)
        out = jnp.dot(pooled, w_ref[...],
                      preferred_element_type=jnp.float32)   # (TB, D)
        o_ref[...] = out + b_ref[...]


def domain_discriminator_forward(x, weight, bias, alpha=0.5, *, ts_target=1024):
    """x: (B, C, T, H, W) f32/bf16; weight: (D, C); bias: (D,) -> (B, D) f32."""
    del alpha  # forward pass of ReverseLayerF is identity
    B, C, T, H, W = x.shape
    D = weight.shape[0]
    S = T * H * W
    itemsize = jnp.dtype(x.dtype).itemsize

    x3 = x.reshape(B, C, S)  # glue reshape, lanes = pooling axis

    # --- batch tile: keep output sublane dim either == full B or a multiple of 8
    if B <= 8:
        TB = B
    else:
        TB = 8
    B_pad = pl.cdiv(B, TB) * TB

    # --- S tile: large multiple of 128 lanes, per-buffer x tile <= ~4 MiB so
    #     2x double-buffered tiles + scratch fit v5e's 16 MiB scoped default
    #     (and leave plenty of headroom on v7x's 64 MiB physical VMEM).
    budget_bytes = 4 * 1024 * 1024
    ts = min(ts_target, max(128, budget_bytes // max(1, TB * C * itemsize)))
    ts = min(ts, pl.cdiv(S, 128) * 128)          # don't over-pad tiny S
    ts = max(128, (ts // 128) * 128)             # multiple of 128 lanes
    S_pad = pl.cdiv(S, ts) * ts

    # Zero-pad (exact: we accumulate a sum and scale by the true 1/S).
    pad_b, pad_s = B_pad - B, S_pad - S
    if pad_b or pad_s:
        x3 = jnp.pad(x3, ((0, pad_b), (0, 0), (0, pad_s)))

    w_t = weight.T.astype(jnp.float32)           # (C, D)
    b2 = bias.reshape(1, D).astype(jnp.float32)  # (1, D)

    grid = (B_pad // TB, S_pad // ts)            # (parallel batch, reduction last)
    inv_s = 1.0 / float(S)                       # compile-time reciprocal

    cost = pl.CostEstimate(
        flops=B_pad * C * S_pad + 2 * B_pad * C * D,
        transcendentals=0,
        bytes_accessed=B_pad * C * S_pad * itemsize + C * D * 4 + D * 4 + B_pad * D * 4,
    )

    out = pl.pallas_call(
        functools.partial(domain_disc_kernel, inv_s=inv_s),
        out_shape=jax.ShapeDtypeStruct((B_pad, D), jnp.float32),
        grid_spec=pltpu.PrefetchScalarGridSpec(
            num_scalar_prefetch=0,
            grid=grid,
            in_specs=[
                pl.BlockSpec((TB, C, ts), lambda i, s: (i, 0, s)),
                pl.BlockSpec((C, D), lambda i, s: (0, 0)),
                pl.BlockSpec((1, D), lambda i, s: (0, 0)),
            ],
            out_specs=pl.BlockSpec((TB, D), lambda i, s: (i, 0)),
            scratch_shapes=[pltpu.VMEM((TB, C), jnp.float32)],
        ),
        compiler_params=pltpu.CompilerParams(
            dimension_semantics=("parallel", "arbitrary"),
        ),
        cost_estimate=cost,
    )(x3, w_t, b2)

    return out[:B]


if __name__ == "__main__":
    # Small deterministic setup consistent with the module:
    #   input_dim = C (channels), domain_num = number of domains.
    B, C, T, H, W = 2, 32, 4, 8, 8
    domain_num = 4

    key = jax.random.PRNGKey(0)
    kx, kw, kb = jax.random.split(key, 3)

    x = jax.random.normal(kx, (B, C, T, H, W), dtype=jnp.float32)
    # Deterministic synthetic Linear parameters (shapes match nn.Linear(C, domain_num)).
    weight = jax.random.normal(kw, (domain_num, C), dtype=jnp.float32) * 0.1
    bias = jax.random.normal(kb, (domain_num,), dtype=jnp.float32) * 0.1

    out = domain_discriminator_forward(x, weight, bias, alpha=0.5)
    out = jax.block_until_ready(out)

    # Pure-JAX reference check (pool over T,H,W then linear).
    pooled_ref = jnp.mean(x, axis=(2, 3, 4))              # (B, C)
    ref = pooled_ref @ weight.T + bias                    # (B, domain_num)
    assert out.shape == (B, domain_num)
    assert jnp.allclose(out, ref, atol=1e-5, rtol=1e-5), "mismatch vs reference"

    # TODO(synk): ReverseLayerF only affects the backward pass (gradient
    # reversal); forward is identity, so no kernel work is needed here.

    print("KERNEL_OK")
</pallas_src>

<mosaic_0001>
module attributes {stable_mosaic.version = 11 : i64} {
  func.func @domain_disc_kernel(%arg0: i32, %arg1: i32, %arg2: memref<2x32x256xf32, #tpu.memory_space<vmem>>, %arg3: memref<32x4xf32, #tpu.memory_space<vmem>>, %arg4: memref<1x4xf32, #tpu.memory_space<vmem>>, %arg5: memref<2x4xf32, #tpu.memory_space<vmem>>, %arg6: memref<2x32xf32, #tpu.memory_space<vmem>>) attributes {dimension_semantics = [#tpu.dimension_semantics<parallel>, #tpu.dimension_semantics<arbitrary>], iteration_bounds = array<i64: 1, 1>, scalar_prefetch = 0 : i64, scratch_operands = 1 : i64, tpu.core_type = #tpu.core_type<tc>, window_params = [{transform_indices = @transform_0, window_bounds = array<i64: 2, 32, 256>}, {pipeline_mode = #tpu.pipeline_mode<synchronous>, transform_indices = @transform_1, window_bounds = array<i64: 32, 4>}, {pipeline_mode = #tpu.pipeline_mode<synchronous>, transform_indices = @transform_2, window_bounds = array<i64: 1, 4>}, {transform_indices = @transform_3, window_bounds = array<i64: 2, 4>}]} {
    %c0_i32 = arith.constant 0 : i32
    %0 = arith.cmpi eq, %arg1, %c0_i32 : i32
    %1 = arith.extui %0 : i1 to i32
    %c0_i32_0 = arith.constant 0 : i32
    %2 = arith.cmpi ne, %1, %c0_i32_0 : i32
    scf.if %2 {
      %cst_9 = arith.constant 0.000000e+00 : f32
      %11 = vector.broadcast %cst_9 : f32 to vector<2x32xf32>
      %c0_10 = arith.constant 0 : index
      %c0_11 = arith.constant 0 : index
      %12 = vector.load %arg6[%c0_10, %c0_11] : memref<2x32xf32, #tpu.memory_space<vmem>>, vector<2x32xf32>
      tpu.vector_store %arg6[%c0_10, %c0_11], %11 {strides = array<i32>} : memref<2x32xf32, #tpu.memory_space<vmem>>, vector<2x32xf32>,
    } else {
    }
    %c0 = arith.constant 0 : index
    %c0_1 = arith.constant 0 : index
    %c0_2 = arith.constant 0 : index
    %3 = vector.load %arg2[%c0, %c0_1, %c0_2] : memref<2x32x256xf32, #tpu.memory_space<vmem>>, vector<2x32x256xf32>
    %c0_3 = arith.constant 0 : index
    %c0_4 = arith.constant 0 : index
    %4 = vector.load %arg6[%c0_3, %c0_4] : memref<2x32xf32, #tpu.memory_space<vmem>>, vector<2x32xf32>
    %cst = arith.constant dense<0.000000e+00> : vector<2x32xf32>
    %5 = vector.multi_reduction <add>, %3, %cst [2] : vector<2x32x256xf32> to vector<2x32xf32>
    %6 = arith.addf %4, %5 : vector<2x32xf32>
    %c0_5 = arith.constant 0 : index
    %c0_6 = arith.constant 0 : index
    %7 = vector.load %arg6[%c0_5, %c0_6] : memref<2x32xf32, #tpu.memory_space<vmem>>, vector<2x32xf32>
    tpu.vector_store %arg6[%c0_5, %c0_6], %6 {strides = array<i32>} : memref<2x32xf32, #tpu.memory_space<vmem>>, vector<2x32xf32>,
    %c0_i32_7 = arith.constant 0 : i32
    %8 = arith.cmpi eq, %arg1, %c0_i32_7 : i32
    %9 = arith.extui %8 : i1 to i32
    %c0_i32_8 = arith.constant 0 : i32
    %10 = arith.cmpi ne, %9, %c0_i32_8 : i32
    scf.if %10 {
      %c0_9 = arith.constant 0 : index
      %c0_10 = arith.constant 0 : index
      %11 = vector.load %arg6[%c0_9, %c0_10] : memref<2x32xf32, #tpu.memory_space<vmem>>, vector<2x32xf32>
      %cst_11 = arith.constant 3.906250e-03 : f32
      %12 = vector.broadcast %cst_11 : f32 to vector<2x32xf32>
      %13 = arith.mulf %11, %12 : vector<2x32xf32>
      %c0_12 = arith.constant 0 : index
      %c0_13 = arith.constant 0 : index
      %14 = vector.load %arg3[%c0_12, %c0_13] : memref<32x4xf32, #tpu.memory_space<vmem>>, vector<32x4xf32>
      %cst_14 = arith.constant dense<0.000000e+00> : vector<2x4xf32>
      %15 = tpu.matmul %13, %14, %cst_14 {dimension_numbers = #tpu.dot_dimension_numbers<[1], [0], [0], [1], [0, 0, 1, 1], [], []>} : vector<2x32xf32>, vector<32x4xf32>, vector<2x4xf32> -> vector<2x4xf32>
      %c0_15 = arith.constant 0 : index
      %c0_16 = arith.constant 0 : index
      %16 = vector.load %arg4[%c0_15, %c0_16] : memref<1x4xf32, #tpu.memory_space<vmem>>, vector<1x4xf32>
      %17 = vector.broadcast %16 : vector<1x4xf32> to vector<2x4xf32>
      %18 = arith.addf %15, %17 : vector<2x4xf32>
      %c0_17 = arith.constant 0 : index
      %c0_18 = arith.constant 0 : index
      %19 = vector.load %arg5[%c0_17, %c0_18] : memref<2x4xf32, #tpu.memory_space<vmem>>, vector<2x4xf32>
      tpu.vector_store %arg5[%c0_17, %c0_18], %18 {strides = array<i32>} : memref<2x4xf32, #tpu.memory_space<vmem>>, vector<2x4xf32>,
    } else {
    }
    return
  }
  func.func @transform_0(%arg0: i32, %arg1: i32) -> (i32, i32, i32) {
    %c0_i32 = arith.constant 0 : i32
    %c0_i32_0 = arith.constant 0 : i32
    return %arg0, %c0_i32, %arg1 : i32, i32, i32
  }
  func.func @transform_1(%arg0: i32, %arg1: i32) -> (i32, i32) {
    %c0_i32 = arith.constant 0 : i32
    %c0_i32_0 = arith.constant 0 : i32
    %c0_i32_1 = arith.constant 0 : i32
    return %c0_i32, %c0_i32_0 : i32, i32
  }
  func.func @transform_2(%arg0: i32, %arg1: i32) -> (i32, i32) {
    %c0_i32 = arith.constant 0 : i32
    %c0_i32_0 = arith.constant 0 : i32
    %c0_i32_1 = arith.constant 0 : i32
    return %c0_i32, %c0_i32_0 : i32, i32
  }
  func.func @transform_3(%arg0: i32, %arg1: i32) -> (i32, i32) {
    %c0_i32 = arith.constant 0 : i32
    %c0_i32_0 = arith.constant 0 : i32
    return %arg0, %c0_i32 : i32, i32
  }
}

</mosaic_0001>

<bundles_post_ra>
// kernel: tpu_custom_call.1
= control target key start
LH: loop header
LB: loop body
LE: loop exit
PB: predicated region body
PF: predicated region fallthrough
CT: control target
= control target key end

     0   :  { %8 = vsyncpa [#allocation4], 0  ;;  %s390_s0 = inlined_call_operand.hbm [shape: f32[2,32,256], index: 0, kind: input, shape index: {}]   ;;  %s391_s1 = inlined_call_operand.vmem [shape: f32[32,4], index: 1, kind: input, shape index: {}]   ;;  %s392_s2 = inlined_call_operand.vmem [shape: f32[1,4], index: 2, kind: input, shape index: {}]   ;;  %s393_s3 = inlined_call_operand.hbm [shape: f32[2,4], index: 3, kind: output, shape index: {}]  }
   0x1   :  { %9 = vsyncpa [#allocation5], 0  ;;  %s322_s12 = smov [#allocation3]   ;;  %s274_s16 = scalar_lea.hbm %s390_s0, 2048 }
   0x2   :  { %s15_s13 = sshll.u32 %s322_s12, 4  ;;  %p275_p0 = scmp.ne.s32.totalorder %s390_s0, %s274_s16  ;;  %s16_s13 = int_to_ptr.vmem [resolvable:$true] %s15_s13 }
   0x3   :  { %p278_p1 = scmp.lt.u32.totalorder %s274_s16, %s390_s0 }
   0x5   :  { %p280_p2 = pnand %p278_p1, %p275_p0 }
   0x7   :  { %283 = shalt.err (!%p280_p2)
}
   0x8   :  { %s284_s21 = scalar_lea.vmem %s16_s13, 2048  ;;  %p289_p4 = scmp.lt.s32.totalorder %s16_s13, %s16_s13 }
   0x9   :  { %p285_p3 = scmp.ne.s32.totalorder %s16_s13, %s284_s21  ;;  %p290_p5 = scmp.lt.s32.totalorder %s284_s21, %s284_s21 }
   0xb   :  { %p291_p6 = por %p290_p5, %p289_p4 }
   0xd   :  { %p292_p7 = pnand %p291_p6, %p285_p3 }
   0xf   :  { %295 = shalt.err (!%p292_p7)
}
  0x10   :  { %s323_s22 = smov 256   ;;  %s324_s23 = smov 16  }
  0x11   :  { %21 = dma.hbm_to_vmem [thread:$0]  %s390_s0, 2048, %s16_s13, [#allocation4], %s323_s22, %s323_s22, %s324_s23  }
  0x12   :  { %318 = dma.done.wait [#allocation4], 2048  }
  0x13   :  { %319 = vsyncadd [#allocation4], 4294965248  ;;  %v43_v0 = vld [vmem:[#allocation3 + $0x40] sm:$0xff]  ;;  %v44_v1 = vld [vmem:[#allocation3 + $0x48] sm:$0xff]  ;;  %vm33_vm0 = vcmask 254976   ;;  %v325_v24 = vmov 0.0   ;;  %v84_v32 = vlaneseq }
  0x14   :  { %v35_v2 = vld [vmem:[#allocation3] sm:$0xff]  ;;  %v64_v3 = vadd.f32 %v44_v1, %v43_v0  ;;  %v36_v4 = vld [vmem:[#allocation3 + $0x8] sm:$0xff]  ;;  %v45_v5 = vld [vmem:[#allocation3 + $0x50] sm:$0xff]  ;;  %34 = vst.msk [vmem:[#allocation2] sm:$0x3] %vm33_vm0, %v325_v24  ;;  %v326_v28 = vmov 0.0|0.0  }
  0x15   :  { %v46_v6 = vld [vmem:[#allocation3 + $0x58] sm:$0xff]  ;;  %v52_v7 = vadd.f32 %v36_v4, %v35_v2  ;;  %v37_v8 = vld [vmem:[#allocation3 + $0x10] sm:$0xff]  ;;  %v47_v12 = vld [vmem:[#allocation3 + $0x60] sm:$0xff]  ;;  %261 = vmatprep.subr.bf16.mxu0 %v326_v28  ;;  %vm327_vm1 = vmmov 0   ;;  %v85_v33 = vand.u32 127, %v84_v32  ;;  %v87_v38 = vshrl.u32 %v84_v32, 7 }
  0x16   :  { %v38_v9 = vld [vmem:[#allocation3 + $0x18] sm:$0xff]  ;;  %65 = vadd.xlane.f32.xlu1 %v64_v3  ;;  %v67_v10 = vadd.f32 %v46_v6, %v45_v5  ;;  %v48_v13 = vld [vmem:[#allocation3 + $0x68] sm:$0xff]  ;;  %v39_v14 = vld [vmem:[#allocation3 + $0x20] sm:$0xff]  ;;  %258 = vmatprep.mubr.msk.f32.mxu0 %vm327_vm1, %v325_v24  ;;  %vm95_vm2 = vcmask 130112   ;;  %vm102_vm3 = vcmask 195712   ;;  %vm109_vm4 = vcmask 261312  }
  0x17   :  { %53 = vadd.xlane.f32.xlu0 %v52_v7  ;;  %v55_v11 = vadd.f32 %v38_v9, %v37_v8  ;;  %v40_v15 = vld [vmem:[#allocation3 + $0x28] sm:$0xff]  ;;  %v70_v16 = vadd.f32 %v48_v13, %v47_v12  ;;  %v49_v18 = vld [vmem:[#allocation3 + $0x70] sm:$0xff]  ;;  %v50_v19 = vld [vmem:[#allocation3 + $0x78] sm:$0xff]  ;;  %v90_v36 = vadd.s32 4294967288, %v85_v33  ;;  %v97_v37 = vadd.s32 4294967280, %v85_v33  ;;  %s328_s7 = smov [#allocation6]  }
  0x18   :  { %v58_v17 = vadd.f32 %v40_v15, %v39_v14  ;;  %v41_v20 = vld [vmem:[#allocation3 + $0x30] sm:$0xff]  ;;  %v42_v21 = vld [vmem:[#allocation3 + $0x38] sm:$0xff]  ;;  %v73_v22 = vadd.f32 %v50_v19, %v49_v18  ;;  %v142_v26 = vld [vmem:[%s391_s1 + $0x8] sm:$0xff]  ;;  %v104_v42 = vadd.s32 4294967272, %v85_v33  ;;  %v88_v44 = vsub.s32 %v85_v33, %v87_v38  ;;  %s234_s8 = sshll.u32 %s328_s7, 4  ;;  %s235_s8 = int_to_ptr.vmem [resolvable:$true] %s234_s8 }
  0x19   :  { %v61_v23 = vadd.f32 %v42_v21, %v41_v20  ;;  %v141_v25 = vld [vmem:[%s391_s1] sm:$0xff]  ;;  %v143_v27 = vld [vmem:[%s391_s1 + $0x10] sm:$0xff]  ;;  %v144_v30 = vld [vmem:[%s391_s1 + $0x18] sm:$0xff]  ;;  %v93_v40 = vsub.s32 %v90_v36, %v87_v38  ;;  %v100_v43 = vsub.s32 %v97_v37, %v87_v38  ;;  %vm130_vm5 = vcmask 1041409   ;;  %s296_s9 = scalar_lea.vmem %s235_s8, 32  ;;  %p301_p9 = scmp.lt.s32.totalorder %s235_s8, %s235_s8 }
  0x1a   :  { %68 = vadd.xlane.f32.xlu1 %v67_v10  ;;  %v262_v29 = vpack.c.bf16 %v142_v26, %v141_v25  ;;  %v265_v31 = vpack.c.bf16 %v144_v30, %v143_v27  ;;  %v107_v48 = vsub.s32 %v104_v42, %v87_v38  ;;  %vm152_vm6 = vcmask 261120   ;;  %v243_v5 = vld [vmem:[%s392_s2] ss:$0 sm:$0xff]  ;;  %p297_p8 = scmp.ne.s32.totalorder %s235_s8, %s296_s9  ;;  %p302_p10 = scmp.lt.s32.totalorder %s296_s9, %s296_s9 }
  0x1b   :  { %56 = vadd.xlane.f32.xlu0 %v55_v11  ;;  %v51_v63 = vld [vmem:[#allocation2] sm:$0x3]  ;;  %vm226_vm7 = vcmask 25600  }
  0x1c   :  { %263 = vmatpush3.bf16.msra.mxu0 %v262_v29  ;;  %p303_p11 = por %p302_p10, %p301_p9 }
  0x1d   :  { %264 = vmatprep.subr.bf16.mxu0 %v326_v28 }
  0x1e   :  { %71 = vadd.xlane.f32.xlu1 %v70_v16  ;;  %p304_p12 = pnand %p303_p11, %p297_p8 }
  0x1f   :  { %59 = vadd.xlane.f32.xlu0 %v58_v17 }
  0x20   :  { %266 = vmatpush3.bf16.msra.mxu0 %v265_v31 }
  0x22   :  { %74 = vadd.xlane.f32.xlu1 %v73_v22 }
  0x23   :  { %62 = vadd.xlane.f32.xlu0 %v61_v23 }
  0xa3   :  { %v66_v34 = vpop.xlane.xlu1 %65 }
  0xa4   :  { %v54_v35 = vpop.xlane.xlu0 %53  ;;  %v114_v51 = vrot.slane %v66_v34, %v88_v44 }
  0xa5   :  { %v89_v53 = vrot.slane %v54_v35, %v88_v44 }
  0xa7   :  { %v69_v39 = vpop.xlane.xlu1 %68 }
  0xa8   :  { %v57_v41 = vpop.xlane.xlu0 %56  ;;  %v118_v46 = vrot.slane %v69_v39, %v93_v40 }
  0xa9   :  { %v94_v49 = vrot.slane %v57_v41, %v93_v40 }
  0xaa   :  { %v119_v55 = vsel %vm95_vm2, %v118_v46, %v114_v51 }
  0xab   :  { %v72_v45 = vpop.xlane.xlu1 %71  ;;  %v96_v58 = vsel %vm95_vm2, %v94_v49, %v89_v53 }
  0xac   :  { %v60_v47 = vpop.xlane.xlu0 %59  ;;  %v123_v50 = vrot.slane %v72_v45, %v100_v43 }
  0xad   :  { %v101_v52 = vrot.slane %v60_v47, %v100_v43 }
  0xae   :  { %v124_v59 = vsel %vm102_vm3, %v123_v50, %v119_v55 }
  0xaf   :  { %v75_v54 = vpop.xlane.xlu1 %74  ;;  %v103_v61 = vsel %vm102_vm3, %v101_v52, %v96_v58 }
  0xb0   :  { %v128_v56 = vrot.slane %v75_v54, %v107_v48  ;;  %v63_v57 = vpop.xlane.xlu0 %62 }
  0xb1   :  { %v108_v60 = vrot.slane %v63_v57, %v107_v48 }
  0xb2   :  { %v129_v62 = vsel %vm109_vm4, %v128_v56, %v124_v59 }
  0xb3   :  { %v110_v0 = vsel %vm109_vm4, %v108_v60, %v103_v61 }
  0xb4   :  { %v131_v1 = vsel %vm130_vm5, %v129_v62, %v110_v0 }
  0xb5   :  { %v133_v2 = vadd.f32 %v131_v1, %v51_v63 }
  0xb7   :  { %135 = vst.msk [vmem:[#allocation2] sm:$0x3] %vm33_vm0, %v133_v2 }
  0xbe   :  { %v139_v3 = vld [vmem:[#allocation2] sm:$0x3] }
  0xbf   :  { %v140_v4 = vmul.f32 0.00390625, %v139_v3 }
  0xc1   :  { %259 = vmatmul.mubr.msk.f32.vlgmr.msra.gmra.mrb[0].mxu0 %vm152_vm6, %v140_v4 }
 0x194   :  { %v222_v6 = vpop.f32.mrb[0].mxu0 }
 0x195   :  { %v223_v7 = vadd.f32 %v243_v5, %v222_v6  ;;  %v260_v8 = vpop.f32.mrb[1].mxu0 }
 0x197   :  { %227 = vst.msk [vmem:[#allocation6] sm:$0x3] %vm226_vm7, %v223_v7 }
 0x198   :  { %307 = shalt.err (!%p304_p12)
}
 0x199   :  { %s308_s12 = scalar_lea.hbm %s393_s3, 32 }
 0x19a   :  { %p309_p13 = scmp.ne.s32.totalorder %s393_s3, %s308_s12  ;;  %p312_p0 = scmp.lt.u32.totalorder %s308_s12, %s393_s3 }
 0x19c   :  { %p314_p1 = pnand %p312_p0, %p309_p13 }
 0x19e   :  { %317 = shalt.err (!%p314_p1)
}
 0x19f   :  { %237 = dma.vmem_to_hbm [thread:$0]  %s235_s8, 32, %s393_s3, [#allocation5]  }
 0x1a0   :  { %320 = dma.done.wait [#allocation5], 32  }
 0x1a1   :  { %321 = vsyncadd [#allocation5], 4294967264 }
 0x1a2   :  { %241 = vsyncpa [#allocation4], 1 }
 0x1a3   :  { %242 = vsyncpa [#allocation5], 1 }

</bundles_post_ra>
